<compile_context>
chip_gen: v5e
topology: v5e:2x2
jax: 0.10.0
libtpu: 0.0.40
codegen_flags: <defaults>
</compile_context>

<pallas_src>
import functools

import jax
import jax.numpy as jnp
from jax.experimental import pallas as pl
from jax.experimental.pallas import tpu as pltpu


def _round_up(x, m):
    return ((x + m - 1) // m) * m


# -----------------------------------------------------------------------------
# Kernel
# -----------------------------------------------------------------------------
def _proposal_kernel(x_ref, w1_ref, b1_ref, w2_ref, b2_ref, o_ref):
    # x: (TB, D) f32/bf16, w1: (D, H) bf16, b1: (1, H) f32,
    # w2: (H, C) bf16, b2: (1, C) f32, o: (TB, C) f32
    x = x_ref[...].astype(jnp.bfloat16)  # bf16 activations -> MXU-native dot

    # fcn1 + ReLU (bf16 x bf16 -> f32 accumulation)
    h = jnp.dot(x, w1_ref[...], preferred_element_type=jnp.float32) + b1_ref[...]
    h = jnp.maximum(h, 0.0)

    # fcn2 (bf16 x bf16 -> f32 accumulation)
    logits = (jnp.dot(h.astype(jnp.bfloat16), w2_ref[...],
                      preferred_element_type=jnp.float32) + b2_ref[...])

    # Numerically stable softmax along lanes (f32 throughout).
    m = jnp.max(logits, axis=-1, keepdims=True)
    e = jnp.exp(logits - m)
    denom = jnp.sum(e, axis=-1, keepdims=True)
    o_ref[...] = e / denom


# -----------------------------------------------------------------------------
# Parameter preparation (one-time; only arrays go into the dict -> jit-safe)
# -----------------------------------------------------------------------------
def prepare_params(w1, b1, w2, b2):
    """w1:(input_dim,hidden), b1:(hidden,), w2:(hidden,n_cat), b2:(n_cat,)."""
    hidden = w1.shape[1]
    n_cat = w2.shape[1]
    return {
        "w1": w1.astype(jnp.bfloat16),
        "b1": jnp.reshape(b1, (1, hidden)).astype(jnp.float32),
        "w2": w2.astype(jnp.bfloat16),
        "b2": jnp.reshape(b2, (1, n_cat)).astype(jnp.float32),
    }


def _choose_batch_tile(B, b_tile):
    # Sublane-aligned tile; ensure >=2 grid steps whenever B allows so the
    # "parallel" batch axis actually shards across both v7x TensorCores.
    two_way = _round_up(pl.cdiv(B, 2), 8) if B > 8 else 8
    return max(8, min(b_tile, two_way, _round_up(B, 8)))


# -----------------------------------------------------------------------------
# Batched forward: (B, input_dim) -> (B, n_categories)
# -----------------------------------------------------------------------------
@functools.partial(jax.jit, static_argnames=("b_tile",))
def categorical_proposal_forward_batched(params, x_rows, b_tile=512):
    B, D = x_rows.shape
    H = params["w1"].shape[1]
    C = params["w2"].shape[1]

    tb = _choose_batch_tile(B, b_tile)
    grid = (pl.cdiv(B, tb),)  # ragged last block: garbage rows sliced off below

    out = pl.pallas_call(
        _proposal_kernel,
        out_shape=jax.ShapeDtypeStruct((B, C), jnp.float32),
        grid_spec=pltpu.PrefetchScalarGridSpec(
            num_scalar_prefetch=0,
            grid=grid,
            in_specs=[
                pl.BlockSpec((tb, D), lambda i: (i, 0)),  # x rows (tiled on batch)
                pl.BlockSpec((D, H), lambda i: (0, 0)),   # w1 (resident)
                pl.BlockSpec((1, H), lambda i: (0, 0)),   # b1
                pl.BlockSpec((H, C), lambda i: (0, 0)),   # w2 (resident)
                pl.BlockSpec((1, C), lambda i: (0, 0)),   # b2
            ],
            out_specs=pl.BlockSpec((tb, C), lambda i: (i, 0)),
        ),
        compiler_params=pltpu.CompilerParams(
            dimension_semantics=("parallel",),  # shard batch across TCs on v7x
        ),
    )(x_rows, params["w1"], params["b1"], params["w2"], params["b2"])

    return out[:B]


# -----------------------------------------------------------------------------
# Single-sample forward: exact PyTorch module semantics
# -----------------------------------------------------------------------------
def categorical_proposal_forward(params, x):
    """x: any shape flattening to (input_dim,) -> returns (n_categories,)."""
    input_dim = params["w1"].shape[0]
    x_row = jnp.reshape(x, (1, input_dim))
    probs = categorical_proposal_forward_batched(params, x_row)
    return jnp.reshape(probs, (-1,))


# -----------------------------------------------------------------------------
# PyTorch-Linear-style init
# -----------------------------------------------------------------------------
def init_params(key, input_dim, n_categories):
    hidden = int((input_dim * n_categories) ** 0.5)
    k1, k2, k3, k4 = jax.random.split(key, 4)

    bound1 = 1.0 / (input_dim ** 0.5)
    # stored as (in, out) == transpose of torch's (out, in)
    w1 = jax.random.uniform(k1, (input_dim, hidden), jnp.float32, -bound1, bound1)
    b1 = jax.random.uniform(k2, (hidden,), jnp.float32, -bound1, bound1)

    bound2 = 1.0 / (hidden ** 0.5)
    w2 = jax.random.uniform(k3, (hidden, n_categories), jnp.float32, -bound2, bound2)
    b2 = jax.random.uniform(k4, (n_categories,), jnp.float32, -bound2, bound2)
    return w1, b1, w2, b2


if __name__ == "__main__":
    input_dim = 64
    n_categories = 16  # hidden = int(sqrt(64*16)) = 32

    key = jax.random.PRNGKey(0)
    key_x, key_xb, key_p = jax.random.split(key, 3)

    w1, b1, w2, b2 = init_params(key_p, input_dim, n_categories)
    params = prepare_params(w1, b1, w2, b2)

    # Reference that mirrors the kernel's arithmetic (bf16 weights+activations,
    # f32 accumulation), so the check isolates kernel plumbing from precision.
    def ref_forward(xr):
        xb = xr.astype(jnp.bfloat16)
        h = jnp.dot(xb, params["w1"], preferred_element_type=jnp.float32) + params["b1"]
        h = jnp.maximum(h, 0.0)
        logits = (jnp.dot(h.astype(jnp.bfloat16), params["w2"],
                          preferred_element_type=jnp.float32) + params["b2"])
        return jax.nn.softmax(logits, axis=-1)

    # ---- single-sample path (matches PyTorch forward exactly) ----
    x = jax.random.normal(key_x, (4, 16), dtype=jnp.float32)  # 4*16 = 64 = input_dim
    probs = categorical_proposal_forward(params, x)
    probs = jax.block_until_ready(probs)

    ref = ref_forward(jnp.reshape(x, (1, -1))).reshape(-1)
    assert probs.shape == (n_categories,)
    assert jnp.allclose(probs, ref, atol=2e-3), "single-sample mismatch vs reference"
    assert jnp.allclose(jnp.sum(probs), 1.0, atol=1e-3)

    # ---- batched path (amortizes launch overhead / fills MXU sublanes) ----
    B = 32
    xb = jax.random.normal(key_xb, (B, input_dim), dtype=jnp.float32)
    probs_b = categorical_proposal_forward_batched(params, xb)
    probs_b = jax.block_until_ready(probs_b)

    ref_b = ref_forward(xb)
    assert probs_b.shape == (B, n_categories)
    assert jnp.allclose(probs_b, ref_b, atol=2e-3), "batched mismatch vs reference"
    assert jnp.allclose(jnp.sum(probs_b, axis=-1), 1.0, atol=1e-3).all()

    print("KERNEL_OK")
</pallas_src>

<mosaic_0001>
module attributes {stable_mosaic.version = 11 : i64} {
  func.func @_proposal_kernel(%arg0: i32, %arg1: memref<8x64xf32, #tpu.memory_space<vmem>>, %arg2: memref<64x32xbf16, #tpu.memory_space<vmem>>, %arg3: memref<1x32xf32, #tpu.memory_space<vmem>>, %arg4: memref<32x16xbf16, #tpu.memory_space<vmem>>, %arg5: memref<1x16xf32, #tpu.memory_space<vmem>>, %arg6: memref<8x16xf32, #tpu.memory_space<vmem>>) attributes {dimension_semantics = [#tpu.dimension_semantics<parallel>], iteration_bounds = array<i64: 1>, scalar_prefetch = 0 : i64, scratch_operands = 0 : i64, tpu.core_type = #tpu.core_type<tc>, window_params = [{transform_indices = @transform_0, window_bounds = array<i64: 8, 64>}, {pipeline_mode = #tpu.pipeline_mode<synchronous>, transform_indices = @transform_1, window_bounds = array<i64: 64, 32>}, {pipeline_mode = #tpu.pipeline_mode<synchronous>, transform_indices = @transform_2, window_bounds = array<i64: 1, 32>}, {pipeline_mode = #tpu.pipeline_mode<synchronous>, transform_indices = @transform_3, window_bounds = array<i64: 32, 16>}, {pipeline_mode = #tpu.pipeline_mode<synchronous>, transform_indices = @transform_4, window_bounds = array<i64: 1, 16>}, {transform_indices = @transform_5, window_bounds = array<i64: 8, 16>}]} {
    %c0 = arith.constant 0 : index
    %c0_0 = arith.constant 0 : index
    %0 = vector.load %arg1[%c0, %c0_0] : memref<8x64xf32, #tpu.memory_space<vmem>>, vector<8x64xf32>
    %1 = arith.truncf %0 : vector<8x64xf32> to vector<8x64xbf16>
    %c0_1 = arith.constant 0 : index
    %c0_2 = arith.constant 0 : index
    %2 = vector.load %arg2[%c0_1, %c0_2] : memref<64x32xbf16, #tpu.memory_space<vmem>>, vector<64x32xbf16>
    %cst = arith.constant dense<0.000000e+00> : vector<8x32xf32>
    %3 = tpu.matmul %1, %2, %cst {dimension_numbers = #tpu.dot_dimension_numbers<[1], [0], [0], [1], [0, 0, 1, 1], [], []>} : vector<8x64xbf16>, vector<64x32xbf16>, vector<8x32xf32> -> vector<8x32xf32>
    %c0_3 = arith.constant 0 : index
    %c0_4 = arith.constant 0 : index
    %4 = vector.load %arg3[%c0_3, %c0_4] : memref<1x32xf32, #tpu.memory_space<vmem>>, vector<1x32xf32>
    %5 = vector.broadcast %4 : vector<1x32xf32> to vector<8x32xf32>
    %6 = arith.addf %3, %5 : vector<8x32xf32>
    %cst_5 = arith.constant 0.000000e+00 : f32
    %7 = vector.broadcast %cst_5 : f32 to vector<8x32xf32>
    %8 = arith.maximumf %6, %7 : vector<8x32xf32>
    %9 = arith.truncf %8 : vector<8x32xf32> to vector<8x32xbf16>
    %c0_6 = arith.constant 0 : index
    %c0_7 = arith.constant 0 : index
    %10 = vector.load %arg4[%c0_6, %c0_7] : memref<32x16xbf16, #tpu.memory_space<vmem>>, vector<32x16xbf16>
    %cst_8 = arith.constant dense<0.000000e+00> : vector<8x16xf32>
    %11 = tpu.matmul %9, %10, %cst_8 {dimension_numbers = #tpu.dot_dimension_numbers<[1], [0], [0], [1], [0, 0, 1, 1], [], []>} : vector<8x32xbf16>, vector<32x16xbf16>, vector<8x16xf32> -> vector<8x16xf32>
    %c0_9 = arith.constant 0 : index
    %c0_10 = arith.constant 0 : index
    %12 = vector.load %arg5[%c0_9, %c0_10] : memref<1x16xf32, #tpu.memory_space<vmem>>, vector<1x16xf32>
    %13 = vector.broadcast %12 : vector<1x16xf32> to vector<8x16xf32>
    %14 = arith.addf %11, %13 : vector<8x16xf32>
    %cst_11 = arith.constant dense<0xFF800000> : vector<8xf32>
    %15 = vector.multi_reduction <maximumf>, %14, %cst_11 [1] : vector<8x16xf32> to vector<8xf32>
    %16 = vector.shape_cast %15 : vector<8xf32> to vector<8x1xf32>
    %17 = vector.broadcast %16 : vector<8x1xf32> to vector<8x16xf32>
    %18 = arith.subf %14, %17 : vector<8x16xf32>
    %19 = math.exp %18 : vector<8x16xf32>
    %cst_12 = arith.constant dense<0.000000e+00> : vector<8xf32>
    %20 = vector.multi_reduction <add>, %19, %cst_12 [1] : vector<8x16xf32> to vector<8xf32>
    %21 = vector.shape_cast %20 : vector<8xf32> to vector<8x1xf32>
    %22 = vector.broadcast %21 : vector<8x1xf32> to vector<8x16xf32>
    %23 = arith.divf %19, %22 : vector<8x16xf32>
    %c0_13 = arith.constant 0 : index
    %c0_14 = arith.constant 0 : index
    %24 = vector.load %arg6[%c0_13, %c0_14] : memref<8x16xf32, #tpu.memory_space<vmem>>, vector<8x16xf32>
    tpu.vector_store %arg6[%c0_13, %c0_14], %23 {strides = array<i32>} : memref<8x16xf32, #tpu.memory_space<vmem>>, vector<8x16xf32>,
    return
  }
  func.func @transform_0(%arg0: i32) -> (i32, i32) {
    %c0_i32 = arith.constant 0 : i32
    %c0_i32_0 = arith.constant 0 : i32
    return %arg0, %c0_i32 : i32, i32
  }
  func.func @transform_1(%arg0: i32) -> (i32, i32) {
    %c0_i32 = arith.constant 0 : i32
    %c0_i32_0 = arith.constant 0 : i32
    %c0_i32_1 = arith.constant 0 : i32
    return %c0_i32, %c0_i32_0 : i32, i32
  }
  func.func @transform_2(%arg0: i32) -> (i32, i32) {
    %c0_i32 = arith.constant 0 : i32
    %c0_i32_0 = arith.constant 0 : i32
    %c0_i32_1 = arith.constant 0 : i32
    return %c0_i32, %c0_i32_0 : i32, i32
  }
  func.func @transform_3(%arg0: i32) -> (i32, i32) {
    %c0_i32 = arith.constant 0 : i32
    %c0_i32_0 = arith.constant 0 : i32
    %c0_i32_1 = arith.constant 0 : i32
    return %c0_i32, %c0_i32_0 : i32, i32
  }
  func.func @transform_4(%arg0: i32) -> (i32, i32) {
    %c0_i32 = arith.constant 0 : i32
    %c0_i32_0 = arith.constant 0 : i32
    %c0_i32_1 = arith.constant 0 : i32
    return %c0_i32, %c0_i32_0 : i32, i32
  }
  func.func @transform_5(%arg0: i32) -> (i32, i32) {
    %c0_i32 = arith.constant 0 : i32
    %c0_i32_0 = arith.constant 0 : i32
    return %arg0, %c0_i32 : i32, i32
  }
}

</mosaic_0001>

<bundles_post_ra>
// kernel: categorical_proposal_forward_batched.1
= control target key start
LH: loop header
LB: loop body
LE: loop exit
PB: predicated region body
PF: predicated region fallthrough
CT: control target
= control target key end

     0   :  { %10 = vsyncpa [#allocation3], 0  ;;  %vm60_vm0 = vcmask 523264   ;;  %vm99_vm1 = vcmask 261120   ;;  %vm116_vm2 = vcmask 130048   ;;  %s293_s0 = inlined_call_operand.vmem [shape: f32[1,64], index: 0, kind: input, shape index: {}]   ;;  %s294_s1 = inlined_call_operand.vmem [shape: bf16[64,32], index: 1, kind: input, shape index: {}]   ;;  %s295_s2 = inlined_call_operand.vmem [shape: f32[1,32], index: 2, kind: input, shape index: {}]   ;;  %s296_s3 = inlined_call_operand.vmem [shape: bf16[32,16], index: 3, kind: input, shape index: {}]   ;;  %s297_s4 = inlined_call_operand.vmem [shape: f32[1,16], index: 4, kind: input, shape index: {}]   ;;  %s298_s5 = inlined_call_operand.hbm [shape: f32[1,16], index: 5, kind: output, shape index: {}]  }
   0x1   :  { %v189_v0 = vld [vmem:[%s294_s1 + $0x18] sm:$0xff]  ;;  %v188_v1 = vld [vmem:[%s294_s1 + $0x10] sm:$0xff]  ;;  %v187_v2 = vld [vmem:[%s294_s1 + $0x8] sm:$0xff] }
   0x2   :  { %68 = vmatpush.bf16.msra.mxu0 %v189_v0  ;;  %v186_v3 = vld [vmem:[%s294_s1] sm:$0xff]  ;;  %v191_v6 = vld [vmem:[%s296_s3 + $0x8] sm:$0xff] }
   0x3   :  { %v22_v4 = vld [vmem:[%s293_s0] sm:$0xff]  ;;  %109 = vmatpush.bf16.msra.mxu1 %v191_v6 }
   0x4   :  { %v23_v5 = vpack.c.bf16 %v22_v4, %v22_v4  ;;  %v190_v7 = vld [vmem:[%s296_s3] sm:$0xff] }
   0x5   :  { %v195_v8 = vld [vmem:[%s295_s2] ss:$0 sm:$0xff] }
   0x6   :  { %69 = vmatpush.bf16.msra.mxu0 %v188_v1  ;;  %v196_v14 = vld [vmem:[%s297_s4] ss:$0 sm:$0xff] }
   0x7   :  { %110 = vmatpush.bf16.msra.mxu1 %v190_v7 }
   0xa   :  { %70 = vmatpush.bf16.msra.mxu0 %v187_v2 }
   0xe   :  { %71 = vmatpush.bf16.msra.mxu0 %v186_v3 }
  0x11   :  { %176 = vmatmul.msk.bf16.vlgmr.msra.gmra.mxu0 %vm60_vm0, %v23_v5 }
  0x8e   :  { %v73_v9 = vpop.f32.mrf.mxu0 }
  0x8f   :  { %v74_v10 = vadd.f32 %v195_v8, %v73_v9 }
  0x91   :  { %v77_v11 = vmax.f32 %v74_v10, 0.0 }
  0x93   :  { %v78_v12 = vpack.c.bf16 %v77_v11, %v77_v11 }
  0x95   :  { %185 = vmatmul.msk.bf16.vlgmr.msra.gmra.mxu1 %vm99_vm1, %v78_v12 }
  0x96   :  { %v75_v13 = vpop.f32.mrf.mxu0 }
 0x112   :  { %v112_v15 = vpop.f32.mrf.mxu1 }
 0x113   :  { %v113_v16 = vadd.f32 %v196_v14, %v112_v15 }
 0x115   :  { %v117_v17 = vsel %vm116_vm2, %v113_v16, -inf }
 0x116   :  { %118 = vmax.xlane.f32.xlu0 %v117_v17 }
 0x11a   :  { %v114_v18 = vpop.f32.mrf.mxu1 }
 0x189   :  { %v119_v19 = vpop.xlane.xlu0 %118 }
 0x18a   :  { %v120_v20 = vsub.f32 %v113_v16, %v119_v19 }
 0x18c   :  { %v121_v21 = vmul.f32 1.442695, %v120_v20 }
 0x18e   :  { %197 = vpow2.f32 %v121_v21 }
 0x194   :  { %v198_v22 = vpop.eup %197 }
 0x195   :  { %v123_v23 = vsel %vm116_vm2, %v198_v22, 0.0 }
 0x196   :  { %124 = vadd.xlane.f32.xlu0 %v123_v23 }
 0x209   :  { %v125_v24 = vpop.xlane.xlu0 %124 }
 0x20a   :  { %199 = vrcp.f32 %v125_v24  ;;  %v137_v28 = vand.u32 2147483648, %v125_v24  ;;  %v135_v30 = vand.u32 2147483647, %v125_v24  ;;  %vm131_vm4 = vweird.f32 %v125_v24 }
 0x20c   :  { %v138_v32 = vor.u32 1.1754944e-38, %v137_v28  ;;  %vm136_vm6 = vcmp.eq.f32.partialorder %v135_v30, 8.507059e+37 }
 0x210   :  { %v200_v25 = vpop.eup %199 }
 0x211   :  { %v127_v26 = vmul.f32 %v200_v25, %v125_v24  ;;  %vm132_vm3 = vweird.f32 %v200_v25 }
 0x212   :  { %vm133_vm5 = vmor %vm131_vm4, %vm132_vm3 }
 0x213   :  { %v128_v27 = vsub.f32 1.0, %v127_v26 }
 0x215   :  { %v129_v29 = vmul.f32 %v200_v25, %v128_v27 }
 0x217   :  { %v130_v31 = vadd.f32 %v200_v25, %v129_v29 }
 0x219   :  { %v134_v33 = vsel %vm133_vm5, %v200_v25, %v130_v31 }
 0x21a   :  { %v139_v34 = vsel %vm136_vm6, %v138_v32, %v134_v33 }
 0x21b   :  { %v140_v35 = vmul.f32 %v198_v22, %v139_v34 }
 0x21d   :  { %141 = vst.msk [vmem:[#allocation2] sm:$0xff] %vm116_vm2, %v140_v35 }
 0x21e   :  { %145 = vsyncadd [#allocation3], 112  ;;  %s148_s4 = sshll.u32 %s298_s5, 4  ;;  %s227_s9 = smov [#allocation2]   ;;  %s149_s4 = int_to_ptr.hbm [resolvable:$true] %s148_s4 }
 0x21f   :  { %s146_s10 = sshll.u32 %s227_s9, 4  ;;  %s228_s11 = smov 16   ;;  %s147_s10 = int_to_ptr.vmem [resolvable:$true] %s146_s10 }
 0x220   :  { %s229_s12 = smov 1  }
 0x221   :  { %154 = dma.vmem_to_hbm [thread:$0]  %s147_s10, 16, %s149_s4, [#allocation3], %s228_s11, %s228_s11, %s229_s12  }
 0x222   :  { %225 = dma.done.wait [#allocation3], 128  }
 0x223   :  { %226 = vsyncadd [#allocation3], 4294967168 }
 0x224   :  { %159 = vsyncpa [#allocation3], 1 }

</bundles_post_ra>
